<compile_context>
chip_gen: v7x
topology: tpu7x:2x2x1
jax: 0.10.0
libtpu: 0.0.40
codegen_flags: <defaults>
</compile_context>

<pallas_src>
import jax
import jax.numpy as jnp
from jax.experimental import pallas as pl
from jax.experimental.pallas import tpu as pltpu

IN_FEATURES = 28 * 28      # 784
HIDDEN = 500
HIDDEN_PAD = 512           # lane-multiple hidden width
NUM_CLASSES = 10
OUT_PAD = 128              # lane-dense output width
_NEG_LARGE = jnp.float32(-1e30)   # "minus infinity" folded into padded b2 lanes


def _round_up(n, m):
    return ((n + m - 1) // m) * m


def _mlp_kernel(x_ref, w1_ref, b1_ref, w2_ref, b2_ref, out_ref):
    # x_ref : (TB, 784)  f32       w1_ref: (784, 512) bf16   b1_ref: (1, 512) f32
    # w2_ref: (512, 128) bf16      b2_ref: (1, 128)   f32    out_ref: (TB, 128) f32
    #
    # In-kernel bf16 cast: VPU work hidden under the MXU; avoids a separate
    # wrapper-side cast pass over HBM.
    x = x_ref[...].astype(jnp.bfloat16)

    # fc1: bf16 MXU inputs, f32 accumulation; bias add + ReLU in f32.
    h = jnp.dot(x, w1_ref[...], preferred_element_type=jnp.float32) + b1_ref[...]
    h = jnp.maximum(h, 0.0)

    # fc2.  Pad-class lanes (>= 10) already carry -1e30 via the padded bias
    # (w2 pad columns are zero), so no explicit masking is needed.
    logits = jnp.dot(h.astype(jnp.bfloat16), w2_ref[...],
                     preferred_element_type=jnp.float32) + b2_ref[...]

    # Numerically stable log_softmax over the class axis (f32 throughout).
    m = jnp.max(logits, axis=-1, keepdims=True)
    shifted = logits - m
    lse = jnp.log(jnp.sum(jnp.exp(shifted), axis=-1, keepdims=True))
    out_ref[...] = (shifted - lse).astype(out_ref.dtype)


def prepare_params(w1, b1, w2, b2):
    """Pad features to lane multiples and cast matmul operands to bf16.

    Weights are stored (in_features, out_features), i.e. the transpose of the
    PyTorch (out, in) layout.  Zero padding of hidden is numerically inert;
    the padded class lanes of b2 are set to -1e30 so they vanish from the
    log_softmax normalizer without any in-kernel masking.
    """
    w1 = jnp.asarray(w1, jnp.float32).reshape(IN_FEATURES, HIDDEN)
    b1 = jnp.asarray(b1, jnp.float32).reshape(1, HIDDEN)
    w2 = jnp.asarray(w2, jnp.float32).reshape(HIDDEN, NUM_CLASSES)
    b2 = jnp.asarray(b2, jnp.float32).reshape(1, NUM_CLASSES)

    w1p = jnp.pad(w1, ((0, 0), (0, HIDDEN_PAD - HIDDEN))).astype(jnp.bfloat16)
    b1p = jnp.pad(b1, ((0, 0), (0, HIDDEN_PAD - HIDDEN)))
    w2p = jnp.pad(w2, ((0, HIDDEN_PAD - HIDDEN),
                       (0, OUT_PAD - NUM_CLASSES))).astype(jnp.bfloat16)
    b2p = jnp.concatenate(
        [b2, jnp.full((1, OUT_PAD - NUM_CLASSES), _NEG_LARGE, jnp.float32)],
        axis=1)
    return w1p, b1p, w2p, b2p


def net_forward(x, params, *, tb_max=2048):
    """x: (B, 1, 28, 28) or (B, 784), float32. Returns (B, 10) log-probs."""
    w1p, b1p, w2p, b2p = params

    x2d = jnp.asarray(x, jnp.float32).reshape(-1, IN_FEATURES)
    B = x2d.shape[0]

    # Batch tile: big (amortizes ~0.35 us/step grid overhead), multiple of 256
    # for the MXU M dim when the batch is large; >= 2 tiles when tiling so the
    # "parallel" axis shards across v7x's two TensorCores.  Small batches just
    # round up to 8 sublanes and run as a single tile.
    if B <= 256:
        TB = max(8, _round_up(B, 8))
    else:
        TB = min(_round_up(tb_max, 256), _round_up(pl.cdiv(B, 2), 256))

    n_tiles = pl.cdiv(B, TB)
    B_pad = n_tiles * TB
    if B_pad != B:
        x2d = jnp.pad(x2d, ((0, B_pad - B), (0, 0)))

    flops = 2 * B_pad * IN_FEATURES * HIDDEN_PAD + 2 * B_pad * HIDDEN_PAD * OUT_PAD
    transcendentals = B_pad * OUT_PAD + B_pad          # exp + log per row
    bytes_accessed = (x2d.size * 4                     # f32 input read
                      + w1p.size * 2 + w2p.size * 2
                      + b1p.size * 4 + b2p.size * 4
                      + B_pad * OUT_PAD * 4)           # f32 output write

    out = pl.pallas_call(
        _mlp_kernel,
        out_shape=jax.ShapeDtypeStruct((B_pad, OUT_PAD), jnp.float32),
        grid=(n_tiles,),
        in_specs=[
            pl.BlockSpec((TB, IN_FEATURES), lambda i: (i, 0)),          # x tile (f32)
            pl.BlockSpec((IN_FEATURES, HIDDEN_PAD), lambda i: (0, 0)),  # w1 (resident)
            pl.BlockSpec((1, HIDDEN_PAD), lambda i: (0, 0)),            # b1
            pl.BlockSpec((HIDDEN_PAD, OUT_PAD), lambda i: (0, 0)),      # w2 (resident)
            pl.BlockSpec((1, OUT_PAD), lambda i: (0, 0)),               # b2 (pad=-1e30)
        ],
        out_specs=pl.BlockSpec((TB, OUT_PAD), lambda i: (i, 0)),
        compiler_params=pltpu.CompilerParams(
            dimension_semantics=("parallel",),
            vmem_limit_bytes=48 * 1024 * 1024),
        cost_estimate=pl.CostEstimate(
            flops=flops,
            transcendentals=transcendentals,
            bytes_accessed=bytes_accessed),
    )(x2d, w1p, b1p, w2p, b2p)

    return out[:B, :NUM_CLASSES]


def init_params(key):
    """Deterministic init mirroring nn.Linear defaults (U(-1/sqrt(fan_in), +)),
    stored as (in, out) == transpose of PyTorch's (out, in) weight layout."""
    k1, k2, k3, k4 = jax.random.split(key, 4)
    bound1 = 1.0 / jnp.sqrt(784.0)
    bound2 = 1.0 / jnp.sqrt(500.0)
    w1 = jax.random.uniform(k1, (IN_FEATURES, HIDDEN), jnp.float32, -bound1, bound1)
    b1 = jax.random.uniform(k2, (1, HIDDEN), jnp.float32, -bound1, bound1)
    w2 = jax.random.uniform(k3, (HIDDEN, NUM_CLASSES), jnp.float32, -bound2, bound2)
    b2 = jax.random.uniform(k4, (1, NUM_CLASSES), jnp.float32, -bound2, bound2)
    return w1, b1, w2, b2


if __name__ == "__main__":
    key = jax.random.PRNGKey(0)
    kx, kp = jax.random.split(key)

    # Small MNIST-like batch, NCHW as in the PyTorch module.
    x = jax.random.normal(kx, (2, 1, 28, 28), dtype=jnp.float32)
    w1, b1, w2, b2 = init_params(kp)
    params = prepare_params(w1, b1, w2, b2)

    out = jax.block_until_ready(net_forward(x, params))

    # Pure-JAX f32 reference (loose tolerance: MXU operands are bf16).
    x2d = x.reshape(-1, IN_FEATURES)
    h_ref = jnp.maximum(x2d @ w1 + b1, 0.0)
    ref = jax.nn.log_softmax(h_ref @ w2 + b2, axis=1)

    assert out.shape == (2, NUM_CLASSES)
    row_sums = jnp.sum(jnp.exp(out), axis=1)
    assert bool(jnp.all(jnp.abs(row_sums - 1.0) < 1e-3))
    assert bool(jnp.max(jnp.abs(out - ref)) < 5e-2)

    print("KERNEL_OK")
</pallas_src>

<mosaic_0001>
module attributes {stable_mosaic.version = 11 : i64} {
  func.func @_mlp_kernel(%arg0: i32, %arg1: memref<8x784xf32, #tpu.memory_space<vmem>>, %arg2: memref<784x512xbf16, #tpu.memory_space<vmem>>, %arg3: memref<1x512xf32, #tpu.memory_space<vmem>>, %arg4: memref<512x128xbf16, #tpu.memory_space<vmem>>, %arg5: memref<1x128xf32, #tpu.memory_space<vmem>>, %arg6: memref<8x128xf32, #tpu.memory_space<vmem>>) attributes {dimension_semantics = [#tpu.dimension_semantics<parallel>], iteration_bounds = array<i64: 1>, scalar_prefetch = 0 : i64, scratch_operands = 0 : i64, tpu.core_type = #tpu.core_type<tc>, window_params = [{transform_indices = @transform_0, window_bounds = array<i64: 8, 784>}, {pipeline_mode = #tpu.pipeline_mode<synchronous>, transform_indices = @transform_1, window_bounds = array<i64: 784, 512>}, {pipeline_mode = #tpu.pipeline_mode<synchronous>, transform_indices = @transform_2, window_bounds = array<i64: 1, 512>}, {pipeline_mode = #tpu.pipeline_mode<synchronous>, transform_indices = @transform_3, window_bounds = array<i64: 512, 128>}, {pipeline_mode = #tpu.pipeline_mode<synchronous>, transform_indices = @transform_4, window_bounds = array<i64: 1, 128>}, {transform_indices = @transform_5, window_bounds = array<i64: 8, 128>}]} {
    %c0 = arith.constant 0 : index
    %c0_0 = arith.constant 0 : index
    %0 = vector.load %arg1[%c0, %c0_0] : memref<8x784xf32, #tpu.memory_space<vmem>>, vector<8x784xf32>
    %1 = arith.truncf %0 : vector<8x784xf32> to vector<8x784xbf16>
    %c0_1 = arith.constant 0 : index
    %c0_2 = arith.constant 0 : index
    %2 = vector.load %arg2[%c0_1, %c0_2] : memref<784x512xbf16, #tpu.memory_space<vmem>>, vector<784x512xbf16>
    %cst = arith.constant dense<0.000000e+00> : vector<8x512xf32>
    %3 = tpu.matmul %1, %2, %cst {dimension_numbers = #tpu.dot_dimension_numbers<[1], [0], [0], [1], [0, 0, 1, 1], [], []>} : vector<8x784xbf16>, vector<784x512xbf16>, vector<8x512xf32> -> vector<8x512xf32>
    %c0_3 = arith.constant 0 : index
    %c0_4 = arith.constant 0 : index
    %4 = vector.load %arg3[%c0_3, %c0_4] : memref<1x512xf32, #tpu.memory_space<vmem>>, vector<1x512xf32>
    %5 = vector.broadcast %4 : vector<1x512xf32> to vector<8x512xf32>
    %6 = arith.addf %3, %5 : vector<8x512xf32>
    %cst_5 = arith.constant 0.000000e+00 : f32
    %7 = vector.broadcast %cst_5 : f32 to vector<8x512xf32>
    %8 = arith.maximumf %6, %7 : vector<8x512xf32>
    %9 = arith.truncf %8 : vector<8x512xf32> to vector<8x512xbf16>
    %c0_6 = arith.constant 0 : index
    %c0_7 = arith.constant 0 : index
    %10 = vector.load %arg4[%c0_6, %c0_7] : memref<512x128xbf16, #tpu.memory_space<vmem>>, vector<512x128xbf16>
    %cst_8 = arith.constant dense<0.000000e+00> : vector<8x128xf32>
    %11 = tpu.matmul %9, %10, %cst_8 {dimension_numbers = #tpu.dot_dimension_numbers<[1], [0], [0], [1], [0, 0, 1, 1], [], []>} : vector<8x512xbf16>, vector<512x128xbf16>, vector<8x128xf32> -> vector<8x128xf32>
    %c0_9 = arith.constant 0 : index
    %c0_10 = arith.constant 0 : index
    %12 = vector.load %arg5[%c0_9, %c0_10] : memref<1x128xf32, #tpu.memory_space<vmem>>, vector<1x128xf32>
    %13 = vector.broadcast %12 : vector<1x128xf32> to vector<8x128xf32>
    %14 = arith.addf %11, %13 : vector<8x128xf32>
    %cst_11 = arith.constant dense<0xFF800000> : vector<8xf32>
    %15 = vector.multi_reduction <maximumf>, %14, %cst_11 [1] : vector<8x128xf32> to vector<8xf32>
    %16 = vector.shape_cast %15 : vector<8xf32> to vector<8x1xf32>
    %17 = vector.broadcast %16 : vector<8x1xf32> to vector<8x128xf32>
    %18 = arith.subf %14, %17 : vector<8x128xf32>
    %19 = math.exp %18 : vector<8x128xf32>
    %cst_12 = arith.constant dense<0.000000e+00> : vector<8xf32>
    %20 = vector.multi_reduction <add>, %19, %cst_12 [1] : vector<8x128xf32> to vector<8xf32>
    %21 = vector.shape_cast %20 : vector<8xf32> to vector<8x1xf32>
    %22 = math.log %21 : vector<8x1xf32>
    %23 = vector.broadcast %22 : vector<8x1xf32> to vector<8x128xf32>
    %24 = arith.subf %18, %23 : vector<8x128xf32>
    %c0_13 = arith.constant 0 : index
    %c0_14 = arith.constant 0 : index
    %25 = vector.load %arg6[%c0_13, %c0_14] : memref<8x128xf32, #tpu.memory_space<vmem>>, vector<8x128xf32>
    tpu.vector_store %arg6[%c0_13, %c0_14], %24 {strides = array<i32>} : memref<8x128xf32, #tpu.memory_space<vmem>>, vector<8x128xf32>,
    return
  }
  func.func @transform_0(%arg0: i32) -> (i32, i32) {
    %c0_i32 = arith.constant 0 : i32
    %c0_i32_0 = arith.constant 0 : i32
    return %arg0, %c0_i32 : i32, i32
  }
  func.func @transform_1(%arg0: i32) -> (i32, i32) {
    %c0_i32 = arith.constant 0 : i32
    %c0_i32_0 = arith.constant 0 : i32
    %c0_i32_1 = arith.constant 0 : i32
    return %c0_i32, %c0_i32_0 : i32, i32
  }
  func.func @transform_2(%arg0: i32) -> (i32, i32) {
    %c0_i32 = arith.constant 0 : i32
    %c0_i32_0 = arith.constant 0 : i32
    %c0_i32_1 = arith.constant 0 : i32
    return %c0_i32, %c0_i32_0 : i32, i32
  }
  func.func @transform_3(%arg0: i32) -> (i32, i32) {
    %c0_i32 = arith.constant 0 : i32
    %c0_i32_0 = arith.constant 0 : i32
    %c0_i32_1 = arith.constant 0 : i32
    return %c0_i32, %c0_i32_0 : i32, i32
  }
  func.func @transform_4(%arg0: i32) -> (i32, i32) {
    %c0_i32 = arith.constant 0 : i32
    %c0_i32_0 = arith.constant 0 : i32
    %c0_i32_1 = arith.constant 0 : i32
    return %c0_i32, %c0_i32_0 : i32, i32
  }
  func.func @transform_5(%arg0: i32) -> (i32, i32) {
    %c0_i32 = arith.constant 0 : i32
    %c0_i32_0 = arith.constant 0 : i32
    return %arg0, %c0_i32 : i32, i32
  }
}

</mosaic_0001>

<bundles_post_ra>
// kernel: tpu_custom_call.1
= control target key start
LH: loop header
LB: loop body
LE: loop exit
PB: predicated region body
PF: predicated region fallthrough
CT: control target
= control target key end

     0   :  { %10 = vsyncpa [#allocation3], 0  ;;  %s2812_s0 = inlined_call_operand.hbm [shape: f32[8,784], index: 0, kind: input, shape index: {}]   ;;  %s2813_s1 = inlined_call_operand.hbm [shape: bf16[784,512], index: 1, kind: input, shape index: {}]   ;;  %s2814_s2 = inlined_call_operand.vmem [shape: f32[1,512], index: 2, kind: input, shape index: {}]   ;;  %s2815_s3 = inlined_call_operand.hbm [shape: bf16[512,128], index: 3, kind: input, shape index: {}]   ;;  %s2816_s4 = inlined_call_operand.vmem [shape: f32[1,128], index: 4, kind: input, shape index: {}]   ;;  %s2817_s5 = inlined_call_operand.hbm [shape: f32[8,128], index: 5, kind: output, shape index: {}]  }
   0x1   :  { %11 = vsyncpa [#allocation6], 0 }
   0x2   :  { %12 = vsyncpa [#allocation4], 0  ;;  %s2719_s18 = smov [#allocation5]   ;;  %s2625_s22 = scalar_lea.hbm %s2813_s1, 25088 }
   0x3   :  { %s28_s19 = sshll.u32 %s2719_s18, 4  ;;  %p2626_p0 = scmp.ne.s32.totalorder %s2813_s1, %s2625_s22  ;;  %s29_s19 = int_to_ptr.vmem [resolvable:$true] %s28_s19 }
   0x4   :  { %p2629_p1 = scmp.lt.u32.totalorder %s2625_s22, %s2813_s1 }
   0x6   :  { %p2631_p2 = pnand %p2629_p1, %p2626_p0 }
   0x8   :  { %2634 = shalt.err (!%p2631_p2)
}
   0x9   :  { %s2635_s27 = scalar_lea.vmem %s29_s19, 25088  ;;  %p2640_p4 = scmp.lt.s32.totalorder %s29_s19, %s29_s19 }
   0xa   :  { %p2636_p3 = scmp.ne.s32.totalorder %s29_s19, %s2635_s27  ;;  %p2641_p5 = scmp.lt.s32.totalorder %s2635_s27, %s2635_s27 }
   0xc   :  { %p2642_p6 = por %p2641_p5, %p2640_p4 }
   0xe   :  { %p2643_p7 = pnand %p2642_p6, %p2636_p3 }
  0x10   :  { %2646 = shalt.err (!%p2643_p7)
}
  0x11   :  { %s2720_s28 = smov 256   ;;  %s2721_s29 = smov 16  }
  0x12   :  { %34 = dma.hbm_to_vmem [thread:$0]  %s2813_s1, 25088, %s29_s19, [#allocation6], %s2720_s28, %s2720_s28, %s2721_s29  }
  0x13   :  { %s2722_s7 = smov [#allocation2]   ;;  %s2723_s9 = smov [#allocation7]  }
  0x14   :  { %s19_s8 = sshll.u32 %s2722_s7, 4  ;;  %s42_s10 = sshll.u32 %s2723_s9, 4  ;;  %s20_s8 = int_to_ptr.vmem [resolvable:$true] %s19_s8  ;;  %s43_s10 = int_to_ptr.vmem [resolvable:$true] %s42_s10 }
  0x15   :  { %s2647_s13 = scalar_lea.hbm %s2812_s0, 896 }
  0x16   :  { %p2648_p8 = scmp.ne.s32.totalorder %s2812_s0, %s2647_s13  ;;  %p2651_p9 = scmp.lt.u32.totalorder %s2647_s13, %s2812_s0 }
  0x18   :  { %p2653_p10 = pnand %p2651_p9, %p2648_p8 }
  0x1a   :  { %2656 = shalt.err (!%p2653_p10)
}
  0x1b   :  { %s2657_s1 = scalar_lea.vmem %s20_s8, 896  ;;  %p2662_p12 = scmp.lt.s32.totalorder %s20_s8, %s20_s8 }
  0x1c   :  { %p2658_p11 = scmp.ne.s32.totalorder %s20_s8, %s2657_s1  ;;  %p2663_p13 = scmp.lt.s32.totalorder %s2657_s1, %s2657_s1 }
  0x1e   :  { %p2664_p0 = por %p2663_p13, %p2662_p12 }
  0x20   :  { %p2665_p1 = pnand %p2664_p0, %p2658_p11 }
  0x22   :  { %2668 = shalt.err (!%p2665_p1)
}
  0x23   :  { %22 = dma.hbm_to_vmem [thread:$0]  %s2812_s0, 896, %s20_s8, [#allocation3]  }
  0x24   :  { %s2669_s22 = scalar_lea.hbm %s2815_s3, 4096 }
  0x25   :  { %p2670_p2 = scmp.ne.s32.totalorder %s2815_s3, %s2669_s22  ;;  %p2673_p3 = scmp.lt.u32.totalorder %s2669_s22, %s2815_s3 }
  0x27   :  { %p2675_p4 = pnand %p2673_p3, %p2670_p2 }
  0x29   :  { %2678 = shalt.err (!%p2675_p4)
}
  0x2a   :  { %s2679_s27 = scalar_lea.vmem %s43_s10, 4096  ;;  %p2684_p6 = scmp.lt.s32.totalorder %s43_s10, %s43_s10 }
  0x2b   :  { %p2680_p5 = scmp.ne.s32.totalorder %s43_s10, %s2679_s27  ;;  %p2685_p7 = scmp.lt.s32.totalorder %s2679_s27, %s2679_s27 }
  0x2d   :  { %p2686_p8 = por %p2685_p7, %p2684_p6 }
  0x2f   :  { %p2687_p9 = pnand %p2686_p8, %p2680_p5 }
  0x31   :  { %2690 = shalt.err (!%p2687_p9)
}
  0x32   :  { %s2724_s0 = smov 64   ;;  %s2725_s28 = smov 4  }
  0x33   :  { %48 = dma.hbm_to_vmem [thread:$0]  %s2815_s3, 4096, %s43_s10, [#allocation6], %s2724_s0, %s2724_s0, %s2725_s28  }
  0x34   :  { %2713 = dma.done.wait [#allocation3], 896  }
  0x35   :  { %2714 = vsyncadd [#allocation3], 4294966400 }
  0x36   :  { %2715 = dma.done.wait [#allocation6], 29184  }
  0x37   :  { %2716 = vsyncadd [#allocation6], 4294938112  ;;  %v2295_v0 = vld [vmem:[#allocation5 + $0x4] ss:$16 sps:$4 sm:$0xff]   ;;  %v2297_v1 = vld [vmem:[#allocation5 + $0xc] ss:$16 sps:$4 sm:$0xff]  }
  0x38   :  { %1277 = vmatprep.subr.bf16.mxu0 %v2295_v0  ;;  %v2299_v2 = vld [vmem:[#allocation5] ss:$16 sps:$4 sm:$0xff]   ;;  %v2300_v3 = vld [vmem:[#allocation5 + $0x8] ss:$16 sps:$4 sm:$0xff]   ;;  %1441 = vmatprep.subr.bf16.mxu1 %v2297_v1  ;;  %v2301_v4 = vld [vmem:[#allocation5 + $0x24] ss:$16 sps:$4 sm:$0xff]  }
  0x39   :  { %1278 = vmatpush1.bf16.msra.mxu0 %v2299_v2  ;;  %1442 = vmatpush1.bf16.msra.mxu1 %v2300_v3  ;;  %v2303_v5 = vld [vmem:[#allocation5 + $0x2c] ss:$16 sps:$4 sm:$0xff]   ;;  %v2305_v6 = vld [vmem:[#allocation5 + $0x20] ss:$16 sps:$4 sm:$0xff]   ;;  %v2306_v7 = vld [vmem:[#allocation5 + $0x28] ss:$16 sps:$4 sm:$0xff]  }
  0x3a   :  { %1279 = vmatprep.subr.bf16.mxu0 %v2301_v4  ;;  %1443 = vmatprep.subr.bf16.mxu1 %v2303_v5  ;;  %v2307_v8 = vld [vmem:[#allocation5 + $0x44] ss:$16 sps:$4 sm:$0xff]   ;;  %v2309_v9 = vld [vmem:[#allocation5 + $0x4c] ss:$16 sps:$4 sm:$0xff]   ;;  %v2311_v10 = vld [vmem:[#allocation5 + $0x40] ss:$16 sps:$4 sm:$0xff]  }
  0x3b   :  { %v2312_v11 = vld [vmem:[#allocation5 + $0x48] ss:$16 sps:$4 sm:$0xff]   ;;  %v2313_v12 = vld [vmem:[#allocation5 + $0x64] ss:$16 sps:$4 sm:$0xff]   ;;  %v2315_v13 = vld [vmem:[#allocation5 + $0x6c] ss:$16 sps:$4 sm:$0xff]  }
  0x3c   :  { %v2317_v14 = vld [vmem:[#allocation5 + $0x60] ss:$16 sps:$4 sm:$0xff]   ;;  %v2318_v15 = vld [vmem:[#allocation5 + $0x68] ss:$16 sps:$4 sm:$0xff]   ;;  %v2319_v16 = vld [vmem:[#allocation5 + $0x84] ss:$16 sps:$4 sm:$0xff]  }
  0x3d   :  { %1280 = vmatpush1.bf16.msra.mxu0 %v2305_v6  ;;  %1444 = vmatpush1.bf16.msra.mxu1 %v2306_v7  ;;  %v2321_v17 = vld [vmem:[#allocation5 + $0x8c] ss:$16 sps:$4 sm:$0xff]   ;;  %v2323_v18 = vld [vmem:[#allocation5 + $0x80] ss:$16 sps:$4 sm:$0xff]   ;;  %v2324_v19 = vld [vmem:[#allocation5 + $0x88] ss:$16 sps:$4 sm:$0xff]  }
  0x3e   :  { %1281 = vmatprep.subr.bf16.mxu0 %v2307_v8  ;;  %1445 = vmatprep.subr.bf16.mxu1 %v2309_v9  ;;  %v2325_v20 = vld [vmem:[#allocation5 + $0xa4] ss:$16 sps:$4 sm:$0xff]   ;;  %v2327_v21 = vld [vmem:[#allocation5 + $0xac] ss:$16 sps:$4 sm:$0xff]   ;;  %v2329_v22 = vld [vmem:[#allocation5 + $0xa0] ss:$16 sps:$4 sm:$0xff]  }
  0x3f   :  { %v2330_v23 = vld [vmem:[#allocation5 + $0xa8] ss:$16 sps:$4 sm:$0xff]   ;;  %v2331_v24 = vld [vmem:[#allocation5 + $0xc4] ss:$16 sps:$4 sm:$0xff]   ;;  %v2333_v25 = vld [vmem:[#allocation5 + $0xcc] ss:$16 sps:$4 sm:$0xff]  }
  0x40   :  { %v2335_v26 = vld [vmem:[#allocation5 + $0xc0] ss:$16 sps:$4 sm:$0xff]   ;;  %v2336_v27 = vld [vmem:[#allocation5 + $0xc8] ss:$16 sps:$4 sm:$0xff]   ;;  %v2337_v28 = vld [vmem:[#allocation5 + $0xe4] ss:$16 sps:$4 sm:$0xff]  }
  0x41   :  { %1282 = vmatpush1.bf16.msra.mxu0 %v2311_v10  ;;  %1446 = vmatpush1.bf16.msra.mxu1 %v2312_v11  ;;  %v2339_v29 = vld [vmem:[#allocation5 + $0xec] ss:$16 sps:$4 sm:$0xff]   ;;  %v2341_v30 = vld [vmem:[#allocation5 + $0xe0] ss:$16 sps:$4 sm:$0xff]   ;;  %v2342_v31 = vld [vmem:[#allocation5 + $0xe8] ss:$16 sps:$4 sm:$0xff]  }
  0x42   :  { %1283 = vmatprep.subr.bf16.mxu0 %v2313_v12  ;;  %1447 = vmatprep.subr.bf16.mxu1 %v2315_v13  ;;  %v2343_v32 = vld [vmem:[#allocation5 + $0x104] ss:$16 sps:$4 sm:$0xff]   ;;  %v2345_v33 = vld [vmem:[#allocation5 + $0x10c] ss:$16 sps:$4 sm:$0xff]   ;;  %v2347_v34 = vld [vmem:[#allocation5 + $0x100] ss:$16 sps:$4 sm:$0xff]  }
  0x43   :  { %v2348_v35 = vld [vmem:[#allocation5 + $0x108] ss:$16 sps:$4 sm:$0xff]   ;;  %v2349_v36 = vld [vmem:[#allocation5 + $0x124] ss:$16 sps:$4 sm:$0xff]   ;;  %v2351_v37 = vld [vmem:[#allocation5 + $0x12c] ss:$16 sps:$4 sm:$0xff]  }
  0x44   :  { %v2353_v38 = vld [vmem:[#allocation5 + $0x120] ss:$16 sps:$4 sm:$0xff]   ;;  %v2354_v39 = vld [vmem:[#allocation5 + $0x128] ss:$16 sps:$4 sm:$0xff]   ;;  %v2355_v40 = vld [vmem:[#allocation5 + $0x144] ss:$16 sps:$4 sm:$0xff]  }
  0x45   :  { %1284 = vmatpush1.bf16.msra.mxu0 %v2317_v14  ;;  %1448 = vmatpush1.bf16.msra.mxu1 %v2318_v15  ;;  %v2357_v41 = vld [vmem:[#allocation5 + $0x14c] ss:$16 sps:$4 sm:$0xff]   ;;  %v2359_v42 = vld [vmem:[#allocation5 + $0x140] ss:$16 sps:$4 sm:$0xff]   ;;  %v2360_v43 = vld [vmem:[#allocation5 + $0x148] ss:$16 sps:$4 sm:$0xff]  }
  0x46   :  { %1285 = vmatprep.subr.bf16.mxu0 %v2319_v16  ;;  %1449 = vmatprep.subr.bf16.mxu1 %v2321_v17  ;;  %v2361_v44 = vld [vmem:[#allocation5 + $0x164] ss:$16 sps:$4 sm:$0xff]   ;;  %v2363_v45 = vld [vmem:[#allocation5 + $0x16c] ss:$16 sps:$4 sm:$0xff]   ;;  %v2365_v47 = vld [vmem:[#allocation5 + $0x160] ss:$16 sps:$4 sm:$0xff]  }
  0x47   :  { %v62_v46 = vld [vmem:[#allocation2 + $0x8] sm:$0xff]  ;;  %v2366_v49 = vld [vmem:[#allocation5 + $0x168] ss:$16 sps:$4 sm:$0xff]   ;;  %v2369_v51 = vld [vmem:[#allocation5 + $0x18c] ss:$16 sps:$4 sm:$0xff]   ;;  %vm1273_vm0 = vcmask 130048  }
  0x48   :  { %v69_v48 = vpack.c.bf16 %v62_v46, %v62_v46  ;;  %v2367_v50 = vld [vmem:[#allocation5 + $0x184] ss:$16 sps:$4 sm:$0xff]   ;;  %v2371_v52 = vld [vmem:[#allocation5 + $0x180] ss:$16 sps:$4 sm:$0xff]   ;;  %v2372_v53 = vld [vmem:[#allocation5 + $0x188] ss:$16 sps:$4 sm:$0xff]  }
  0x49   :  { %1286 = vmatpush1.bf16.msra.mxu0 %v2323_v18  ;;  %1450 = vmatpush1.bf16.msra.mxu1 %v2324_v19  ;;  %v2373_v54 = vld [vmem:[#allocation5 + $0x1a4] ss:$16 sps:$4 sm:$0xff]   ;;  %v2375_v55 = vld [vmem:[#allocation5 + $0x1ac] ss:$16 sps:$4 sm:$0xff]   ;;  %v2377_v56 = vld [vmem:[#allocation5 + $0x1a0] ss:$16 sps:$4 sm:$0xff]  }
  0x4a   :  { %1287 = vmatprep.subr.bf16.mxu0 %v2325_v20  ;;  %1451 = vmatprep.subr.bf16.mxu1 %v2327_v21  ;;  %v2378_v57 = vld [vmem:[#allocation5 + $0x1a8] ss:$16 sps:$4 sm:$0xff]   ;;  %v2379_v58 = vld [vmem:[#allocation5 + $0x1c4] ss:$16 sps:$4 sm:$0xff]   ;;  %v2381_v59 = vld [vmem:[#allocation5 + $0x1cc] ss:$16 sps:$4 sm:$0xff]  }
  0x4b   :  { %1309 = vmatprep.mubr.bf16.mxu0 %v69_v48  ;;  %1473 = vmatprep.mubr.bf16.mxu1 %v69_v48  ;;  %v2383_v60 = vld [vmem:[#allocation5 + $0x1c0] ss:$16 sps:$4 sm:$0xff]   ;;  %v2384_v61 = vld [vmem:[#allocation5 + $0x1c8] ss:$16 sps:$4 sm:$0xff]   ;;  %v2385_v62 = vld [vmem:[#allocation5 + $0x1e4] ss:$16 sps:$4 sm:$0xff]  }
  0x4c   :  { %v2387_v63 = vld [vmem:[#allocation5 + $0x1ec] ss:$16 sps:$4 sm:$0xff]   ;;  %v2389_v0 = vld [vmem:[#allocation5 + $0x1e0] ss:$16 sps:$4 sm:$0xff]   ;;  %v2390_v1 = vld [vmem:[#allocation5 + $0x1e8] ss:$16 sps:$4 sm:$0xff]  }
  0x4d   :  { %1288 = vmatpush1.bf16.msra.mxu0 %v2329_v22  ;;  %1452 = vmatpush1.bf16.msra.mxu1 %v2330_v23  ;;  %v61_v2 = vld [vmem:[#allocation2] sm:$0xff]  ;;  %v2393_v3 = vld [vmem:[#allocation5 + $0x204] ss:$16 sps:$4 sm:$0xff]   ;;  %v2391_v6 = vld [vmem:[#allocation5 + $0x200] ss:$16 sps:$4 sm:$0xff]  }
  0x4e   :  { %1289 = vmatprep.subr.bf16.mxu0 %v2331_v24  ;;  %1453 = vmatprep.subr.bf16.mxu1 %v2333_v25  ;;  %v2396_v4 = vld [vmem:[#allocation5 + $0x20c] ss:$16 sps:$4 sm:$0xff]   ;;  %v68_v5 = vpack.c.bf16 %v61_v2, %v61_v2  ;;  %v2394_v7 = vld [vmem:[#allocation5 + $0x208] ss:$16 sps:$4 sm:$0xff]   ;;  %v2399_v8 = vld [vmem:[#allocation5 + $0x224] ss:$16 sps:$4 sm:$0xff]  }
  0x4f   :  { %v2402_v9 = vld [vmem:[#allocation5 + $0x22c] ss:$16 sps:$4 sm:$0xff]   ;;  %v2397_v10 = vld [vmem:[#allocation5 + $0x220] ss:$16 sps:$4 sm:$0xff]   ;;  %v2400_v11 = vld [vmem:[#allocation5 + $0x228] ss:$16 sps:$4 sm:$0xff]  }
  0x50   :  { %v2405_v12 = vld [vmem:[#allocation5 + $0x244] ss:$16 sps:$4 sm:$0xff]   ;;  %v2408_v13 = vld [vmem:[#allocation5 + $0x24c] ss:$16 sps:$4 sm:$0xff]   ;;  %v2403_v14 = vld [vmem:[#allocation5 + $0x240] ss:$16 sps:$4 sm:$0xff]  }
  0x51   :  { %1290 = vmatpush1.bf16.msra.mxu0 %v2335_v26  ;;  %1454 = vmatpush1.bf16.msra.mxu1 %v2336_v27  ;;  %v2406_v15 = vld [vmem:[#allocation5 + $0x248] ss:$16 sps:$4 sm:$0xff]   ;;  %v2411_v16 = vld [vmem:[#allocation5 + $0x264] ss:$16 sps:$4 sm:$0xff]   ;;  %v2414_v17 = vld [vmem:[#allocation5 + $0x26c] ss:$16 sps:$4 sm:$0xff]  }
  0x52   :  { %1291 = vmatprep.subr.bf16.mxu0 %v2337_v28  ;;  %1455 = vmatprep.subr.bf16.mxu1 %v2339_v29  ;;  %v2409_v18 = vld [vmem:[#allocation5 + $0x260] ss:$16 sps:$4 sm:$0xff]   ;;  %v2412_v19 = vld [vmem:[#allocation5 + $0x268] ss:$16 sps:$4 sm:$0xff]   ;;  %v2417_v20 = vld [vmem:[#allocation5 + $0x284] ss:$16 sps:$4 sm:$0xff]  }
  0x53   :  { %v2420_v21 = vld [vmem:[#allocation5 + $0x28c] ss:$16 sps:$4 sm:$0xff]   ;;  %v2415_v22 = vld [vmem:[#allocation5 + $0x280] ss:$16 sps:$4 sm:$0xff]   ;;  %v2418_v23 = vld [vmem:[#allocation5 + $0x288] ss:$16 sps:$4 sm:$0xff]  }
  0x54   :  { %v2423_v24 = vld [vmem:[#allocation5 + $0x2a4] ss:$16 sps:$4 sm:$0xff]   ;;  %v2426_v25 = vld [vmem:[#allocation5 + $0x2ac] ss:$16 sps:$4 sm:$0xff]   ;;  %v2421_v26 = vld [vmem:[#allocation5 + $0x2a0] ss:$16 sps:$4 sm:$0xff]  }
  0x55   :  { %1292 = vmatpush1.bf16.msra.mxu0 %v2341_v30  ;;  %1456 = vmatpush1.bf16.msra.mxu1 %v2342_v31  ;;  %v2424_v27 = vld [vmem:[#allocation5 + $0x2a8] ss:$16 sps:$4 sm:$0xff]   ;;  %v2429_v28 = vld [vmem:[#allocation5 + $0x2c4] ss:$16 sps:$4 sm:$0xff]   ;;  %v2432_v29 = vld [vmem:[#allocation5 + $0x2cc] ss:$16 sps:$4 sm:$0xff]  }
  0x56   :  { %1293 = vmatprep.subr.bf16.mxu0 %v2343_v32  ;;  %1457 = vmatprep.subr.bf16.mxu1 %v2345_v33  ;;  %v64_v30 = vld [vmem:[#allocation2 + $0x18] sm:$0xff]  ;;  %v2430_v33 = vld [vmem:[#allocation5 + $0x2c8] ss:$16 sps:$4 sm:$0xff]  }
  0x57   :  { %v2427_v31 = vld [vmem:[#allocation5 + $0x2c0] ss:$16 sps:$4 sm:$0xff]   ;;  %v71_v32 = vpack.c.bf16 %v64_v30, %v64_v30  ;;  %v2453_v46 = vld [vmem:[#allocation5 + $0x344] ss:$16 sps:$4 sm:$0xff]  }
  0x58   :  { %v2451_v48 = vld [vmem:[#allocation5 + $0x340] ss:$16 sps:$4 sm:$0xff]   ;;  %v2483_v2 = vld [vmem:[#allocation5 + $0x3e4] ss:$16 sps:$4 sm:$0xff]  }
  0x59   :  { %1294 = vmatpush1.bf16.msra.mxu0 %v2347_v34  ;;  %1458 = vmatpush1.bf16.msra.mxu1 %v2348_v35  ;;  %v2435_v34 = vld [vmem:[#allocation5 + $0x2e4] ss:$16 sps:$4 sm:$0xff]   ;;  %v2438_v35 = vld [vmem:[#allocation5 + $0x2ec] ss:$16 sps:$4 sm:$0xff]  }
  0x5a   :  { %1295 = vmatprep.subr.bf16.mxu0 %v2349_v36  ;;  %1459 = vmatprep.subr.bf16.mxu1 %v2351_v37  ;;  %v2433_v36 = vld [vmem:[#allocation5 + $0x2e0] ss:$16 sps:$4 sm:$0xff]   ;;  %v2436_v37 = vld [vmem:[#allocation5 + $0x2e8] ss:$16 sps:$4 sm:$0xff]   ;;  %v2519_v30 = vld [vmem:[#allocation5 + $0x4a4] ss:$16 sps:$4 sm:$0xff]  }
  0x5d   :  { %1296 = vmatpush1.bf16.msra.mxu0 %v2353_v38  ;;  %1460 = vmatpush1.bf16.msra.mxu1 %v2354_v39  ;;  %v2441_v38 = vld [vmem:[#allocation5 + $0x304] ss:$16 sps:$4 sm:$0xff]   ;;  %v2444_v39 = vld [vmem:[#allocation5 + $0x30c] ss:$16 sps:$4 sm:$0xff]  }
  0x5e   :  { %1297 = vmatprep.subr.bf16.mxu0 %v2355_v40  ;;  %1461 = vmatprep.subr.bf16.mxu1 %v2357_v41  ;;  %v2439_v40 = vld [vmem:[#allocation5 + $0x300] ss:$16 sps:$4 sm:$0xff]   ;;  %v2442_v41 = vld [vmem:[#allocation5 + $0x308] ss:$16 sps:$4 sm:$0xff]  }
  0x61   :  { %1298 = vmatpush1.bf16.msra.mxu0 %v2359_v42  ;;  %1462 = vmatpush1.bf16.msra.mxu1 %v2360_v43  ;;  %v2447_v42 = vld [vmem:[#allocation5 + $0x324] ss:$16 sps:$4 sm:$0xff]   ;;  %v2450_v43 = vld [vmem:[#allocation5 + $0x32c] ss:$16 sps:$4 sm:$0xff]  }
  0x62   :  { %1299 = vmatprep.subr.bf16.mxu0 %v2361_v44  ;;  %1463 = vmatprep.subr.bf16.mxu1 %v2363_v45  ;;  %v2445_v44 = vld [vmem:[#allocation5 + $0x320] ss:$16 sps:$4 sm:$0xff]   ;;  %v2448_v45 = vld [vmem:[#allocation5 + $0x328] ss:$16 sps:$4 sm:$0xff]  }
  0x65   :  { %1300 = vmatpush1.bf16.msra.mxu0 %v2365_v47  ;;  %1464 = vmatpush1.bf16.msra.mxu1 %v2366_v49  ;;  %v2456_v47 = vld [vmem:[#allocation5 + $0x34c] ss:$16 sps:$4 sm:$0xff]   ;;  %v2454_v49 = vld [vmem:[#allocation5 + $0x348] ss:$16 sps:$4 sm:$0xff]  }
  0x66   :  { %1301 = vmatprep.subr.bf16.mxu0 %v2367_v50  ;;  %1465 = vmatprep.subr.bf16.mxu1 %v2369_v51  ;;  %v2459_v50 = vld [vmem:[#allocation5 + $0x364] ss:$16 sps:$4 sm:$0xff]   ;;  %v2462_v51 = vld [vmem:[#allocation5 + $0x36c] ss:$16 sps:$4 sm:$0xff]  }
  0x69   :  { %1302 = vmatpush1.bf16.msra.mxu0 %v2371_v52  ;;  %1466 = vmatpush1.bf16.msra.mxu1 %v2372_v53  ;;  %v2457_v52 = vld [vmem:[#allocation5 + $0x360] ss:$16 sps:$4 sm:$0xff]   ;;  %v2460_v53 = vld [vmem:[#allocation5 + $0x368] ss:$16 sps:$4 sm:$0xff]  }
  0x6a   :  { %1303 = vmatprep.subr.bf16.mxu0 %v2373_v54  ;;  %1467 = vmatprep.subr.bf16.mxu1 %v2375_v55  ;;  %v2465_v54 = vld [vmem:[#allocation5 + $0x384] ss:$16 sps:$4 sm:$0xff]   ;;  %v2468_v55 = vld [vmem:[#allocation5 + $0x38c] ss:$16 sps:$4 sm:$0xff]  }
  0x6d   :  { %1304 = vmatpush1.bf16.msra.mxu0 %v2377_v56  ;;  %1468 = vmatpush1.bf16.msra.mxu1 %v2378_v57  ;;  %v2463_v56 = vld [vmem:[#allocation5 + $0x380] ss:$16 sps:$4 sm:$0xff]   ;;  %v2466_v57 = vld [vmem:[#allocation5 + $0x388] ss:$16 sps:$4 sm:$0xff]  }
  0x6e   :  { %1305 = vmatprep.subr.bf16.mxu0 %v2379_v58  ;;  %1469 = vmatprep.subr.bf16.mxu1 %v2381_v59  ;;  %v2471_v58 = vld [vmem:[#allocation5 + $0x3a4] ss:$16 sps:$4 sm:$0xff]   ;;  %v2474_v59 = vld [vmem:[#allocation5 + $0x3ac] ss:$16 sps:$4 sm:$0xff]  }
  0x71   :  { %1306 = vmatpush1.bf16.msra.mxu0 %v2383_v60  ;;  %1470 = vmatpush1.bf16.msra.mxu1 %v2384_v61  ;;  %v2469_v60 = vld [vmem:[#allocation5 + $0x3a0] ss:$16 sps:$4 sm:$0xff]   ;;  %v2472_v61 = vld [vmem:[#allocation5 + $0x3a8] ss:$16 sps:$4 sm:$0xff]  }
  0x72   :  { %1307 = vmatprep.subr.bf16.mxu0 %v2385_v62  ;;  %1471 = vmatprep.subr.bf16.mxu1 %v2387_v63  ;;  %v2477_v62 = vld [vmem:[#allocation5 + $0x3c4] ss:$16 sps:$4 sm:$0xff]   ;;  %v2480_v63 = vld [vmem:[#allocation5 + $0x3cc] ss:$16 sps:$4 sm:$0xff]  }
  0x75   :  { %1308 = vmatpush1.bf16.msra.mxu0 %v2389_v0  ;;  %1472 = vmatpush1.bf16.msra.mxu1 %v2390_v1  ;;  %v2475_v0 = vld [vmem:[#allocation5 + $0x3c0] ss:$16 sps:$4 sm:$0xff]   ;;  %v2478_v1 = vld [vmem:[#allocation5 + $0x3c8] ss:$16 sps:$4 sm:$0xff]  }
  0x76   :  { %1318 = vmatprep.subr.bf16.mxu0 %v2393_v3  ;;  %1482 = vmatprep.subr.bf16.mxu1 %v2396_v4  ;;  %v2486_v3 = vld [vmem:[#allocation5 + $0x3ec] ss:$16 sps:$4 sm:$0xff]   ;;  %v2481_v4 = vld [vmem:[#allocation5 + $0x3e0] ss:$16 sps:$4 sm:$0xff]  }
  0x78   :  { %1310 = vmatmul.mubr.bf16.vlgmr.msra.gmra.mrb[0].mxu0 %v68_v5  ;;  %1474 = vmatmul.mubr.bf16.vlgmr.msra.gmra.mrb[0].mxu1 %v68_v5  ;;  %v2484_v5 = vld [vmem:[#allocation5 + $0x3e8] ss:$16 sps:$4 sm:$0xff]  }
  0x79   :  { %1319 = vmatpush1.bf16.msra.mxu0 %v2391_v6  ;;  %1483 = vmatpush1.bf16.msra.mxu1 %v2394_v7  ;;  %v2489_v6 = vld [vmem:[#allocation5 + $0x404] ss:$16 sps:$4 sm:$0xff]   ;;  %v63_v7 = vld [vmem:[#allocation2 + $0x10] sm:$0xff] }
  0x7a   :  { %1320 = vmatprep.subr.bf16.mxu0 %v2399_v8  ;;  %1484 = vmatprep.subr.bf16.mxu1 %v2402_v9  ;;  %v2492_v8 = vld [vmem:[#allocation5 + $0x40c] ss:$16 sps:$4 sm:$0xff]   ;;  %v2487_v9 = vld [vmem:[#allocation5 + $0x400] ss:$16 sps:$4 sm:$0xff]  }
  0x7b   :  { %1350 = vmatprep.mubr.bf16.mxu0 %v71_v32  ;;  %1514 = vmatprep.mubr.bf16.mxu1 %v71_v32  ;;  %v2517_v32 = vld [vmem:[#allocation5 + $0x4a0] ss:$16 sps:$4 sm:$0xff]  }
  0x7d   :  { %1321 = vmatpush1.bf16.msra.mxu0 %v2397_v10  ;;  %1485 = vmatpush1.bf16.msra.mxu1 %v2400_v11  ;;  %v70_v10 = vpack.c.bf16 %v63_v7, %v63_v7  ;;  %v2490_v11 = vld [vmem:[#allocation5 + $0x408] ss:$16 sps:$4 sm:$0xff]   ;;  %v2582_v7 = vld [vmem:[#allocation5 + $0x5ec] ss:$16 sps:$4 sm:$0xff]  }
  0x7e   :  { %1322 = vmatprep.subr.bf16.mxu0 %v2405_v12  ;;  %1486 = vmatprep.subr.bf16.mxu1 %v2408_v13  ;;  %v2495_v12 = vld [vmem:[#allocation5 + $0x424] ss:$16 sps:$4 sm:$0xff]   ;;  %v2498_v13 = vld [vmem:[#allocation5 + $0x42c] ss:$16 sps:$4 sm:$0xff]  }
  0x81   :  { %1323 = vmatpush1.bf16.msra.mxu0 %v2403_v14  ;;  %1487 = vmatpush1.bf16.msra.mxu1 %v2406_v15  ;;  %v66_v14 = vld [vmem:[#allocation2 + $0x28] sm:$0xff] }
  0x82   :  { %1324 = vmatprep.subr.bf16.mxu0 %v2411_v16  ;;  %1488 = vmatprep.subr.bf16.mxu1 %v2414_v17  ;;  %v73_v15 = vpack.c.bf16 %v66_v14, %v66_v14  ;;  %v2493_v16 = vld [vmem:[#allocation5 + $0x420] ss:$16 sps:$4 sm:$0xff]   ;;  %v2496_v17 = vld [vmem:[#allocation5 + $0x428] ss:$16 sps:$4 sm:$0xff]  }
  0x83   :  { %v2583_v14 = vld [vmem:[#allocation5 + $0x600] ss:$16 sps:$4 sm:$0xff]  }
  0x85   :  { %1325 = vmatpush1.bf16.msra.mxu0 %v2409_v18  ;;  %1489 = vmatpush1.bf16.msra.mxu1 %v2412_v19  ;;  %v2501_v18 = vld [vmem:[#allocation5 + $0x444] ss:$16 sps:$4 sm:$0xff]   ;;  %v2504_v19 = vld [vmem:[#allocation5 + $0x44c] ss:$16 sps:$4 sm:$0xff]  }
  0x86   :  { %1326 = vmatprep.subr.bf16.mxu0 %v2417_v20  ;;  %1490 = vmatprep.subr.bf16.mxu1 %v2420_v21  ;;  %v2499_v20 = vld [vmem:[#allocation5 + $0x440] ss:$16 sps:$4 sm:$0xff]   ;;  %v2502_v21 = vld [vmem:[#allocation5 + $0x448] ss:$16 sps:$4 sm:$0xff]  }
  0x89   :  { %1327 = vmatpush1.bf16.msra.mxu0 %v2415_v22  ;;  %1491 = vmatpush1.bf16.msra.mxu1 %v2418_v23  ;;  %v2507_v22 = vld [vmem:[#allocation5 + $0x464] ss:$16 sps:$4 sm:$0xff]   ;;  %v2510_v23 = vld [vmem:[#allocation5 + $0x46c] ss:$16 sps:$4 sm:$0xff]  }
  0x8a   :  { %1328 = vmatprep.subr.bf16.mxu0 %v2423_v24  ;;  %1492 = vmatprep.subr.bf16.mxu1 %v2426_v25  ;;  %v2505_v24 = vld [vmem:[#allocation5 + $0x460] ss:$16 sps:$4 sm:$0xff]   ;;  %v2508_v25 = vld [vmem:[#allocation5 + $0x468] ss:$16 sps:$4 sm:$0xff]  }
  0x8d   :  { %1329 = vmatpush1.bf16.msra.mxu0 %v2421_v26  ;;  %1493 = vmatpush1.bf16.msra.mxu1 %v2424_v27  ;;  %v2513_v26 = vld [vmem:[#allocation5 + $0x484] ss:$16 sps:$4 sm:$0xff]   ;;  %v2516_v27 = vld [vmem:[#allocation5 + $0x48c] ss:$16 sps:$4 sm:$0xff]  }
  0x8e   :  { %1330 = vmatprep.subr.bf16.mxu0 %v2429_v28  ;;  %1494 = vmatprep.subr.bf16.mxu1 %v2432_v29  ;;  %v2511_v28 = vld [vmem:[#allocation5 + $0x480] ss:$16 sps:$4 sm:$0xff]   ;;  %v2514_v29 = vld [vmem:[#allocation5 + $0x488] ss:$16 sps:$4 sm:$0xff]  }
  0x91   :  { %1331 = vmatpush1.bf16.msra.mxu0 %v2427_v31  ;;  %1495 = vmatpush1.bf16.msra.mxu1 %v2430_v33  ;;  %v2522_v31 = vld [vmem:[#allocation5 + $0x4ac] ss:$16 sps:$4 sm:$0xff]   ;;  %v2520_v33 = vld [vmem:[#allocation5 + $0x4a8] ss:$16 sps:$4 sm:$0xff]  }
  0x92   :  { %1332 = vmatprep.subr.bf16.mxu0 %v2435_v34  ;;  %1496 = vmatprep.subr.bf16.mxu1 %v2438_v35  ;;  %v2525_v34 = vld [vmem:[#allocation5 + $0x4c4] ss:$16 sps:$4 sm:$0xff]   ;;  %v2528_v35 = vld [vmem:[#allocation5 + $0x4cc] ss:$16 sps:$4 sm:$0xff]  }
  0x95   :  { %1333 = vmatpush1.bf16.msra.mxu0 %v2433_v36  ;;  %1497 = vmatpush1.bf16.msra.mxu1 %v2436_v37  ;;  %v2523_v36 = vld [vmem:[#allocation5 + $0x4c0] ss:$16 sps:$4 sm:$0xff]   ;;  %v2526_v37 = vld [vmem:[#allocation5 + $0x4c8] ss:$16 sps:$4 sm:$0xff]  }
  0x96   :  { %1334 = vmatprep.subr.bf16.mxu0 %v2441_v38  ;;  %1498 = vmatprep.subr.bf16.mxu1 %v2444_v39  ;;  %v2531_v38 = vld [vmem:[#allocation5 + $0x4e4] ss:$16 sps:$4 sm:$0xff]   ;;  %v2534_v39 = vld [vmem:[#allocation5 + $0x4ec] ss:$16 sps:$4 sm:$0xff]  }
  0x99   :  { %1335 = vmatpush1.bf16.msra.mxu0 %v2439_v40  ;;  %1499 = vmatpush1.bf16.msra.mxu1 %v2442_v41  ;;  %v2529_v40 = vld [vmem:[#allocation5 + $0x4e0] ss:$16 sps:$4 sm:$0xff]   ;;  %v2532_v41 = vld [vmem:[#allocation5 + $0x4e8] ss:$16 sps:$4 sm:$0xff]  }
  0x9a   :  { %1336 = vmatprep.subr.bf16.mxu0 %v2447_v42  ;;  %1500 = vmatprep.subr.bf16.mxu1 %v2450_v43  ;;  %v2537_v42 = vld [vmem:[#allocation5 + $0x504] ss:$16 sps:$4 sm:$0xff]   ;;  %v2540_v43 = vld [vmem:[#allocation5 + $0x50c] ss:$16 sps:$4 sm:$0xff]  }
  0x9d   :  { %1337 = vmatpush1.bf16.msra.mxu0 %v2445_v44  ;;  %1501 = vmatpush1.bf16.msra.mxu1 %v2448_v45  ;;  %v2535_v44 = vld [vmem:[#allocation5 + $0x500] ss:$16 sps:$4 sm:$0xff]   ;;  %v2538_v45 = vld [vmem:[#allocation5 + $0x508] ss:$16 sps:$4 sm:$0xff]  }
  0x9e   :  { %1338 = vmatprep.subr.bf16.mxu0 %v2453_v46  ;;  %1502 = vmatprep.subr.bf16.mxu1 %v2456_v47  ;;  %v2543_v46 = vld [vmem:[#allocation5 + $0x524] ss:$16 sps:$4 sm:$0xff]   ;;  %v2546_v47 = vld [vmem:[#allocation5 + $0x52c] ss:$16 sps:$4 sm:$0xff]  }
  0xa1   :  { %1339 = vmatpush1.bf16.msra.mxu0 %v2451_v48  ;;  %1503 = vmatpush1.bf16.msra.mxu1 %v2454_v49  ;;  %v2541_v48 = vld [vmem:[#allocation5 + $0x520] ss:$16 sps:$4 sm:$0xff]   ;;  %v2544_v49 = vld [vmem:[#allocation5 + $0x528] ss:$16 sps:$4 sm:$0xff]  }
  0xa2   :  { %1340 = vmatprep.subr.bf16.mxu0 %v2459_v50  ;;  %1504 = vmatprep.subr.bf16.mxu1 %v2462_v51  ;;  %v2549_v50 = vld [vmem:[#allocation5 + $0x544] ss:$16 sps:$4 sm:$0xff]   ;;  %v2552_v51 = vld [vmem:[#allocation5 + $0x54c] ss:$16 sps:$4 sm:$0xff]  }
  0xa5   :  { %1341 = vmatpush1.bf16.msra.mxu0 %v2457_v52  ;;  %1505 = vmatpush1.bf16.msra.mxu1 %v2460_v53  ;;  %v2547_v52 = vld [vmem:[#allocation5 + $0x540] ss:$16 sps:$4 sm:$0xff]   ;;  %v2550_v53 = vld [vmem:[#allocation5 + $0x548] ss:$16 sps:$4 sm:$0xff]  }
  0xa6   :  { %1342 = vmatprep.subr.bf16.mxu0 %v2465_v54  ;;  %1506 = vmatprep.subr.bf16.mxu1 %v2468_v55  ;;  %v2555_v54 = vld [vmem:[#allocation5 + $0x564] ss:$16 sps:$4 sm:$0xff]   ;;  %v2558_v55 = vld [vmem:[#allocation5 + $0x56c] ss:$16 sps:$4 sm:$0xff]  }
  0xa9   :  { %1343 = vmatpush1.bf16.msra.mxu0 %v2463_v56  ;;  %1507 = vmatpush1.bf16.msra.mxu1 %v2466_v57  ;;  %v2553_v56 = vld [vmem:[#allocation5 + $0x560] ss:$16 sps:$4 sm:$0xff]   ;;  %v2556_v57 = vld [vmem:[#allocation5 + $0x568] ss:$16 sps:$4 sm:$0xff]  }
  0xaa   :  { %1344 = vmatprep.subr.bf16.mxu0 %v2471_v58  ;;  %1508 = vmatprep.subr.bf16.mxu1 %v2474_v59  ;;  %v2561_v58 = vld [vmem:[#allocation5 + $0x584] ss:$16 sps:$4 sm:$0xff]   ;;  %v2564_v59 = vld [vmem:[#allocation5 + $0x58c] ss:$16 sps:$4 sm:$0xff]  }
  0xad   :  { %1345 = vmatpush1.bf16.msra.mxu0 %v2469_v60  ;;  %1509 = vmatpush1.bf16.msra.mxu1 %v2472_v61  ;;  %v2559_v60 = vld [vmem:[#allocation5 + $0x580] ss:$16 sps:$4 sm:$0xff]   ;;  %v2562_v61 = vld [vmem:[#allocation5 + $0x588] ss:$16 sps:$4 sm:$0xff]  }
  0xae   :  { %1346 = vmatprep.subr.bf16.mxu0 %v2477_v62  ;;  %1510 = vmatprep.subr.bf16.mxu1 %v2480_v63  ;;  %v2567_v62 = vld [vmem:[#allocation5 + $0x5a4] ss:$16 sps:$4 sm:$0xff]   ;;  %v2570_v63 = vld [vmem:[#allocation5 + $0x5ac] ss:$16 sps:$4 sm:$0xff]  }
  0xb1   :  { %1347 = vmatpush1.bf16.msra.mxu0 %v2475_v0  ;;  %1511 = vmatpush1.bf16.msra.mxu1 %v2478_v1  ;;  %v2565_v0 = vld [vmem:[#allocation5 + $0x5a0] ss:$16 sps:$4 sm:$0xff]   ;;  %v2568_v1 = vld [vmem:[#allocation5 + $0x5a8] ss:$16 sps:$4 sm:$0xff]  }
  0xb2   :  { %1348 = vmatprep.subr.bf16.mxu0 %v2483_v2  ;;  %1512 = vmatprep.subr.bf16.mxu1 %v2486_v3  ;;  %v2573_v2 = vld [vmem:[#allocation5 + $0x5c4] ss:$16 sps:$4 sm:$0xff]   ;;  %v2576_v3 = vld [vmem:[#allocation5 + $0x5cc] ss:$16 sps:$4 sm:$0xff]  }
  0xb5   :  { %1349 = vmatpush1.bf16.msra.mxu0 %v2481_v4  ;;  %1513 = vmatpush1.bf16.msra.mxu1 %v2484_v5  ;;  %v2571_v4 = vld [vmem:[#allocation5 + $0x5c0] ss:$16 sps:$4 sm:$0xff]   ;;  %v2574_v5 = vld [vmem:[#allocation5 + $0x5c8] ss:$16 sps:$4 sm:$0xff]  }
  0xb6   :  { %1359 = vmatprep.subr.bf16.mxu0 %v2489_v6  ;;  %1523 = vmatprep.subr.bf16.mxu1 %v2492_v8  ;;  %v2579_v6 = vld [vmem:[#allocation5 + $0x5e4] ss:$16 sps:$4 sm:$0xff]   ;;  %v2577_v8 = vld [vmem:[#allocation5 + $0x5e0] ss:$16 sps:$4 sm:$0xff]  }
  0xb8   :  { %1351 = vmatmul.mubr.bf16.vlgmr.msra.gmra.mrb[0].mxu0 %v70_v10  ;;  %1515 = vmatmul.mubr.bf16.vlgmr.msra.gmra.mrb[0].mxu1 %v70_v10  ;;  %v65_v10 = vld [vmem:[#allocation2 + $0x20] sm:$0xff] }
  0xb9   :  { %1360 = vmatpush1.bf16.msra.mxu0 %v2487_v9  ;;  %1524 = vmatpush1.bf16.msra.mxu1 %v2490_v11  ;;  %v2580_v9 = vld [vmem:[#allocation5 + $0x5e8] ss:$16 sps:$4 sm:$0xff]   ;;  %v2585_v11 = vld [vmem:[#allocation5 + $0x604] ss:$16 sps:$4 sm:$0xff]  }
  0xba   :  { %1361 = vmatprep.subr.bf16.mxu0 %v2495_v12  ;;  %1525 = vmatprep.subr.bf16.mxu1 %v2498_v13  ;;  %v2588_v12 = vld [vmem:[#allocation5 + $0x60c] ss:$16 sps:$4 sm:$0xff]   ;;  %v72_v13 = vpack.c.bf16 %v65_v10, %v65_v10 }
  0xbb   :  { %1391 = vmatprep.mubr.bf16.mxu0 %v73_v15  ;;  %1555 = vmatprep.mubr.bf16.mxu1 %v73_v15  ;;  %v2586_v15 = vld [vmem:[#allocation5 + $0x608] ss:$16 sps:$4 sm:$0xff]  }
  0xbd   :  { %1362 = vmatpush1.bf16.msra.mxu0 %v2493_v16  ;;  %1526 = vmatpush1.bf16.msra.mxu1 %v2496_v17  ;;  %v2589_v16 = vld [vmem:[#allocation7 + $0x40] sm:$0xff]  }
  0xbe   :  { %1363 = vmatprep.subr.bf16.mxu0 %v2501_v18  ;;  %1527 = vmatprep.subr.bf16.mxu1 %v2504_v19  ;;  %v2590_v17 = vld [vmem:[#allocation7 + $0xc0] sm:$0xff]   ;;  %v2726_v18 = vmov 0   ;;  %v67_v19 = vld [vmem:[#allocation2 + $0x30] sm:$0xff] }
  0xc1   :  { %1364 = vmatpush1.bf16.msra.mxu0 %v2499_v20  ;;  %1528 = vmatpush1.bf16.msra.mxu1 %v2502_v21  ;;  %v74_v20 = vpack.c.bf16 %v67_v19, %v67_v19  ;;  %v2591_v21 = vld [vmem:[#allocation7] sm:$0xff]  }
  0xc2   :  { %1365 = vmatprep.subr.bf16.mxu0 %v2507_v22  ;;  %1529 = vmatprep.subr.bf16.mxu1 %v2510_v23  ;;  %v2592_v22 = vld [vmem:[#allocation7 + $0x80] sm:$0xff]   ;;  %v2593_v23 = vld [vmem:[#allocation7 + $0x48] sm:$0xff]  }
  0xc5   :  { %1366 = vmatpush1.bf16.msra.mxu0 %v2505_v24  ;;  %1530 = vmatpush1.bf16.msra.mxu1 %v2508_v25  ;;  %v2594_v24 = vld [vmem:[#allocation7 + $0xc8] sm:$0xff]  }
  0xc6   :  { %1367 = vmatprep.subr.bf16.mxu0 %v2513_v26  ;;  %1531 = vmatprep.subr.bf16.mxu1 %v2516_v27  ;;  %v2595_v25 = vld [vmem:[#allocation7 + $0x8] sm:$0xff]   ;;  %v2597_v27 = vld [vmem:[#allocation7 + $0x50] sm:$0xff]  }
  0xc7   :  { %v2596_v26 = vld [vmem:[#allocation7 + $0x88] sm:$0xff]  }
  0xc9   :  { %1368 = vmatpush1.bf16.msra.mxu0 %v2511_v28  ;;  %1532 = vmatpush1.bf16.msra.mxu1 %v2514_v29  ;;  %v2598_v28 = vld [vmem:[#allocation7 + $0xd0] sm:$0xff]  }
  0xca   :  { %1369 = vmatprep.subr.bf16.mxu0 %v2519_v30  ;;  %1533 = vmatprep.subr.bf16.mxu1 %v2522_v31  ;;  %v2599_v29 = vld [vmem:[#allocation7 + $0x10] sm:$0xff]   ;;  %v2601_v31 = vld [vmem:[#allocation7 + $0x58] sm:$0xff]  }
  0xcb   :  { %v2600_v30 = vld [vmem:[#allocation7 + $0x90] sm:$0xff]  }
  0xcd   :  { %1370 = vmatpush1.bf16.msra.mxu0 %v2517_v32  ;;  %1534 = vmatpush1.bf16.msra.mxu1 %v2520_v33  ;;  %v2602_v32 = vld [vmem:[#allocation7 + $0xd8] sm:$0xff]  }
  0xce   :  { %1371 = vmatprep.subr.bf16.mxu0 %v2525_v34  ;;  %1535 = vmatprep.subr.bf16.mxu1 %v2528_v35  ;;  %v2603_v33 = vld [vmem:[#allocation7 + $0x18] sm:$0xff]   ;;  %v2605_v35 = vld [vmem:[#allocation7 + $0x60] sm:$0xff]  }
  0xcf   :  { %v2604_v34 = vld [vmem:[#allocation7 + $0x98] sm:$0xff]  }
  0xd1   :  { %1372 = vmatpush1.bf16.msra.mxu0 %v2523_v36  ;;  %1536 = vmatpush1.bf16.msra.mxu1 %v2526_v37  ;;  %v2606_v36 = vld [vmem:[#allocation7 + $0xe0] sm:$0xff]  }
  0xd2   :  { %1373 = vmatprep.subr.bf16.mxu0 %v2531_v38  ;;  %1537 = vmatprep.subr.bf16.mxu1 %v2534_v39  ;;  %v2607_v37 = vld [vmem:[#allocation7 + $0x20] sm:$0xff]   ;;  %v2609_v39 = vld [vmem:[#allocation7 + $0x68] sm:$0xff]  }
  0xd3   :  { %v2608_v38 = vld [vmem:[#allocation7 + $0xa0] sm:$0xff]  }
  0xd5   :  { %1374 = vmatpush1.bf16.msra.mxu0 %v2529_v40  ;;  %1538 = vmatpush1.bf16.msra.mxu1 %v2532_v41  ;;  %v2610_v40 = vld [vmem:[#allocation7 + $0xe8] sm:$0xff]  }
  0xd6   :  { %1375 = vmatprep.subr.bf16.mxu0 %v2537_v42  ;;  %1539 = vmatprep.subr.bf16.mxu1 %v2540_v43  ;;  %v2611_v41 = vld [vmem:[#allocation7 + $0x28] sm:$0xff]   ;;  %v2613_v43 = vld [vmem:[#allocation7 + $0x70] sm:$0xff]  }
  0xd7   :  { %v2612_v42 = vld [vmem:[#allocation7 + $0xa8] sm:$0xff]  }
  0xd9   :  { %1376 = vmatpush1.bf16.msra.mxu0 %v2535_v44  ;;  %1540 = vmatpush1.bf16.msra.mxu1 %v2538_v45  ;;  %v2614_v44 = vld [vmem:[#allocation7 + $0xf0] sm:$0xff]  }
  0xda   :  { %1377 = vmatprep.subr.bf16.mxu0 %v2543_v46  ;;  %1541 = vmatprep.subr.bf16.mxu1 %v2546_v47  ;;  %v2615_v45 = vld [vmem:[#allocation7 + $0x30] sm:$0xff]   ;;  %v2617_v47 = vld [vmem:[#allocation7 + $0x78] sm:$0xff]  }
  0xdb   :  { %v2616_v46 = vld [vmem:[#allocation7 + $0xb0] sm:$0xff]  }
  0xdd   :  { %1378 = vmatpush1.bf16.msra.mxu0 %v2541_v48  ;;  %1542 = vmatpush1.bf16.msra.mxu1 %v2544_v49  ;;  %v2618_v48 = vld [vmem:[#allocation7 + $0xf8] sm:$0xff]  }
  0xde   :  { %1379 = vmatprep.subr.bf16.mxu0 %v2549_v50  ;;  %1543 = vmatprep.subr.bf16.mxu1 %v2552_v51  ;;  %v2619_v49 = vld [vmem:[#allocation7 + $0x38] sm:$0xff]   ;;  %v273_v51 = vlaneseq }
  0xdf   :  { %v2620_v50 = vld [vmem:[#allocation7 + $0xb8] sm:$0xff]  }
  0xe1   :  { %1380 = vmatpush1.bf16.msra.mxu0 %v2547_v52  ;;  %1544 = vmatpush1.bf16.msra.mxu1 %v2550_v53  ;;  %v274_v52 = vshrl.u32 %v273_v51, 7 }
  0xe2   :  { %1381 = vmatprep.subr.bf16.mxu0 %v2555_v54  ;;  %1545 = vmatprep.subr.bf16.mxu1 %v2558_v55  ;;  %v271_v55 = vld [vmem:[%s2814_s2] sm:$0xf] }
  0xe3   :  { %v275_v53 = vsub.s32 0, %v274_v52  ;;  %v283_v54 = vsub.s32 2, %v274_v52 }
  0xe5   :  { %1382 = vmatpush1.bf16.msra.mxu0 %v2553_v56  ;;  %1546 = vmatpush1.bf16.msra.mxu1 %v2556_v57  ;;  %v279_v56 = vsub.s32 1, %v274_v52  ;;  %v287_v57 = vsub.s32 3, %v274_v52 }
  0xe6   :  { %1383 = vmatprep.subr.bf16.mxu0 %v2561_v58  ;;  %1547 = vmatprep.subr.bf16.mxu1 %v2564_v59  ;;  %v276_v58 = vrot.slane %v271_v55, %v275_v53  ;;  %v284_v59 = vrot.slane %v271_v55, %v283_v54 }
  0xe9   :  { %1384 = vmatpush1.bf16.msra.mxu0 %v2559_v60  ;;  %1548 = vmatpush1.bf16.msra.mxu1 %v2562_v61  ;;  %v280_v60 = vrot.slane %v271_v55, %v279_v56  ;;  %v288_v61 = vrot.slane %v271_v55, %v287_v57 }
  0xea   :  { %1385 = vmatprep.subr.bf16.mxu0 %v2567_v62  ;;  %1549 = vmatprep.subr.bf16.mxu1 %v2570_v63 }
  0xed   :  { %1386 = vmatpush1.bf16.msra.mxu0 %v2565_v0  ;;  %1550 = vmatpush1.bf16.msra.mxu1 %v2568_v1 }
  0xee   :  { %1387 = vmatprep.subr.bf16.mxu0 %v2573_v2  ;;  %1551 = vmatprep.subr.bf16.mxu1 %v2576_v3 }
  0xf1   :  { %1388 = vmatpush1.bf16.msra.mxu0 %v2571_v4  ;;  %1552 = vmatpush1.bf16.msra.mxu1 %v2574_v5 }
  0xf2   :  { %1389 = vmatprep.subr.bf16.mxu0 %v2579_v6  ;;  %1553 = vmatprep.subr.bf16.mxu1 %v2582_v7 }
  0xf5   :  { %1390 = vmatpush1.bf16.msra.mxu0 %v2577_v8  ;;  %1554 = vmatpush1.bf16.msra.mxu1 %v2580_v9 }
  0xf6   :  { %1400 = vmatprep.subr.bf16.mxu0 %v2585_v11  ;;  %1564 = vmatprep.subr.bf16.mxu1 %v2588_v12 }
  0xf8   :  { %1392 = vmatmul.mubr.bf16.vlgmr.msra.gmra.mrb[0].mxu0 %v72_v13  ;;  %1556 = vmatmul.mubr.bf16.vlgmr.msra.gmra.mrb[0].mxu1 %v72_v13 }
  0xf9   :  { %1401 = vmatpush1.bf16.msra.mxu0 %v2583_v14  ;;  %1565 = vmatpush1.bf16.msra.mxu1 %v2586_v15 }
  0xfa   :  { %1432 = vmatprep.mubr.bf16.mxu0 %v2726_v18  ;;  %1596 = vmatprep.mubr.bf16.mxu1 %v2726_v18 }
  0xfb   :  { %2214 = vmatprep.subr.bf16.mxu0 %v2589_v16  ;;  %2236 = vmatprep.subr.bf16.mxu1 %v2590_v17 }
 0x104   :  { %2179 = vmatmul.mubr.msk.bf16.vlgmr.msra.gmra.mrb[0].mxu0 %vm1273_vm0, %v74_v20  ;;  %2180 = vmatmul.mubr.msk.bf16.vlgmr.msra.gmra.mrb[0].mxu1 %vm1273_vm0, %v74_v20  ;;  %v2181_v20 = vld [vmem:[%s2816_s4] ss:$0 sm:$0xff]  ;;  %s2727_s4 = smov [#allocation8]  }
 0x105   :  { %2215 = vmatpush3.bf16.msra.mxu0 %v2591_v21  ;;  %2237 = vmatpush3.bf16.msra.mxu1 %v2592_v22  ;;  %s1973_s8 = sshll.u32 %s2727_s4, 4  ;;  %s1974_s8 = int_to_ptr.vmem [resolvable:$true] %s1973_s8 }
 0x106   :  { %2216 = vmatprep.subr.bf16.mxu0 %v2593_v23  ;;  %2238 = vmatprep.subr.bf16.mxu1 %v2594_v24  ;;  %s2691_s9 = scalar_lea.vmem %s1974_s8, 128  ;;  %p2696_p11 = scmp.lt.s32.totalorder %s1974_s8, %s1974_s8 }
 0x107   :  { %p2692_p10 = scmp.ne.s32.totalorder %s1974_s8, %s2691_s9  ;;  %p2697_p12 = scmp.lt.s32.totalorder %s2691_s9, %s2691_s9 }
 0x109   :  { %2217 = vmatpush3.bf16.msra.mxu0 %v2595_v25  ;;  %2239 = vmatpush3.bf16.msra.mxu1 %v2596_v26  ;;  %p2698_p13 = por %p2697_p12, %p2696_p11 }
 0x10a   :  { %2218 = vmatprep.subr.bf16.mxu0 %v2597_v27  ;;  %2240 = vmatprep.subr.bf16.mxu1 %v2598_v28 }
 0x10b   :  { %p2699_p0 = pnand %p2698_p13, %p2692_p10 }
 0x10d   :  { %2219 = vmatpush3.bf16.msra.mxu0 %v2599_v29  ;;  %2241 = vmatpush3.bf16.msra.mxu1 %v2600_v30 }
 0x10e   :  { %2220 = vmatprep.subr.bf16.mxu0 %v2601_v31  ;;  %2242 = vmatprep.subr.bf16.mxu1 %v2602_v32 }
 0x111   :  { %2221 = vmatpush3.bf16.msra.mxu0 %v2603_v33  ;;  %2243 = vmatpush3.bf16.msra.mxu1 %v2604_v34 }
 0x112   :  { %2222 = vmatprep.subr.bf16.mxu0 %v2605_v35  ;;  %2244 = vmatprep.subr.bf16.mxu1 %v2606_v36 }
 0x115   :  { %2223 = vmatpush3.bf16.msra.mxu0 %v2607_v37  ;;  %2245 = vmatpush3.bf16.msra.mxu1 %v2608_v38 }
 0x116   :  { %2224 = vmatprep.subr.bf16.mxu0 %v2609_v39  ;;  %2246 = vmatprep.subr.bf16.mxu1 %v2610_v40 }
 0x119   :  { %2225 = vmatpush3.bf16.msra.mxu0 %v2611_v41  ;;  %2247 = vmatpush3.bf16.msra.mxu1 %v2612_v42 }
 0x11a   :  { %2226 = vmatprep.subr.bf16.mxu0 %v2613_v43  ;;  %2248 = vmatprep.subr.bf16.mxu1 %v2614_v44 }
 0x11d   :  { %2227 = vmatpush3.bf16.msra.mxu0 %v2615_v45  ;;  %2249 = vmatpush3.bf16.msra.mxu1 %v2616_v46 }
 0x11e   :  { %2228 = vmatprep.subr.bf16.mxu0 %v2617_v47  ;;  %2250 = vmatprep.subr.bf16.mxu1 %v2618_v48 }
 0x121   :  { %2229 = vmatpush3.bf16.msra.mxu0 %v2619_v49  ;;  %2251 = vmatpush3.bf16.msra.mxu1 %v2620_v50 }
 0x1d7   :  { %v1434_v62 = vpop.f32.mrb[0].mxu0  ;;  %v1598_v63 = vpop.f32.mrb[0].mxu1 }
 0x1d8   :  { %v2258_v0 = vadd.f32 %v1434_v62, %v276_v58  ;;  %v2260_v1 = vadd.f32 %v1598_v63, %v284_v59  ;;  %v1436_v2 = vpop.f32.mrb[1].mxu0  ;;  %v1600_v3 = vpop.f32.mrb[1].mxu1 }
 0x1d9   :  { %v2259_v4 = vadd.f32 %v1436_v2, %v280_v60  ;;  %v2261_v5 = vadd.f32 %v1600_v3, %v288_v61  ;;  %v1438_v6 = vpop.f32.mrb[2].mxu0  ;;  %v1602_v7 = vpop.f32.mrb[2].mxu1 }
 0x1da   :  { %v1605_v8 = vmax.f32 %v2258_v0, 0.0  ;;  %v1607_v9 = vmax.f32 %v2260_v1, 0.0  ;;  %v1439_v10 = vpop.f32.mrb[3].mxu0  ;;  %v1603_v11 = vpop.f32.mrb[3].mxu1 }
 0x1db   :  { %v1606_v12 = vmax.f32 %v2259_v4, 0.0  ;;  %v1608_v13 = vmax.f32 %v2261_v5, 0.0 }
 0x1dc   :  { %v1609_v16 = vpack.c.bf16 %v1605_v8, %v1605_v8  ;;  %v1611_v17 = vpack.c.bf16 %v1607_v9, %v1607_v9 }
 0x1dd   :  { %v1610_v14 = vpack.c.bf16 %v1606_v12, %v1606_v12  ;;  %v1612_v15 = vpack.c.bf16 %v1608_v13, %v1608_v13 }
 0x1df   :  { %1908 = vmatprep.mubr.bf16.mxu0 %v1610_v14  ;;  %1948 = vmatprep.mubr.bf16.mxu1 %v1612_v15 }
 0x1e0   :  { %1909 = vmatmul.mubr.bf16.vlgmr.msra.gmra.mrb[4].mxu0 %v1609_v16  ;;  %1949 = vmatmul.mubr.bf16.vlgmr.msra.gmra.mrb[4].mxu1 %v1611_v17 }
 0x2b3   :  { %v2230_v18 = vpop.f32.mrb[4].mxu0  ;;  %v2252_v19 = vpop.f32.mrb[4].mxu1 }
 0x2b4   :  { %v2231_v21 = vpop.f32.mrb[5].mxu0  ;;  %v2253_v22 = vpop.f32.mrb[5].mxu1 }
 0x2b5   :  { %v2232_v23 = vadd.f32 %v2231_v21, %v2230_v18  ;;  %v2254_v24 = vadd.f32 %v2253_v22, %v2252_v19  ;;  %v2233_v25 = vpop.f32.mrb[6].mxu0  ;;  %v2255_v26 = vpop.f32.mrb[6].mxu1 }
 0x2b6   :  { %v2234_v27 = vpop.f32.mrb[7].mxu0  ;;  %v2256_v28 = vpop.f32.mrb[7].mxu1 }
 0x2b7   :  { %v1911_v29 = vadd.f32 %v2232_v23, %v2181_v20 }
 0x2b9   :  { %v1951_v30 = vadd.f32 %v2254_v24, %v1911_v29 }
 0x2bb   :  { %1956 = vmax.xlane.f32.xlu0 %v1951_v30 }
 0x348   :  { %v1957_v31 = vpop.xlane.xlu0 %1956 }
 0x349   :  { %v1958_v32 = vsub.f32 %v1951_v30, %v1957_v31 }
 0x34b   :  { %v1959_v33 = vmul.f32 1.442695, %v1958_v32 }
 0x34d   :  { %2621 = vpow2.f32 %v1959_v33 }
 0x357   :  { %v2622_v34 = vpop.eup %2621 }
 0x358   :  { %1961 = vadd.xlane.f32.xlu0 %v2622_v34 }
 0x3e5   :  { %v1962_v35 = vpop.xlane.xlu0 %1961 }
 0x3e6   :  { %2623 = vlog2.f32 %v1962_v35 }
 0x3f0   :  { %v2624_v36 = vpop.eup %2623 }
 0x3f1   :  { %v1964_v37 = vmul.f32 0.6931472, %v2624_v36 }
 0x3f3   :  { %v1965_v38 = vsub.f32 %v1958_v32, %v1964_v37 }
 0x3f5   :  { %1966 = vst [vmem:[#allocation8] sm:$0xff] %v1965_v38 }
 0x3f6   :  { %2702 = shalt.err (!%p2699_p0)
}
 0x3f7   :  { %s2703_s12 = scalar_lea.hbm %s2817_s5, 128 }
 0x3f8   :  { %p2704_p1 = scmp.ne.s32.totalorder %s2817_s5, %s2703_s12  ;;  %p2707_p2 = scmp.lt.u32.totalorder %s2703_s12, %s2817_s5 }
 0x3fa   :  { %p2709_p3 = pnand %p2707_p2, %p2704_p1 }
 0x3fc   :  { %2712 = shalt.err (!%p2709_p3)
}
 0x3fd   :  { %1976 = dma.vmem_to_hbm [thread:$0]  %s1974_s8, 128, %s2817_s5, [#allocation4]  }
 0x3fe   :  { %2717 = dma.done.wait [#allocation4], 128  }
 0x3ff   :  { %2718 = vsyncadd [#allocation4], 4294967168 }
 0x400   :  { %1980 = vsyncpa [#allocation3], 1 }
 0x401   :  { %1981 = vsyncpa [#allocation6], 1 }
 0x402   :  { %1982 = vsyncpa [#allocation4], 1 }

</bundles_post_ra>
